<compile_context>
chip_gen: v7x
topology: tpu7x:2x2x1
jax: 0.10.0
libtpu: 0.0.40
codegen_flags: <defaults>
</compile_context>

<pallas_src>
import functools
import math

import jax
import jax.numpy as jnp
from jax.experimental import pallas as pl
from jax.experimental.pallas import tpu as pltpu

NODE_PAD = 128   # node dim padded to a multiple of this (sublane/lane friendly)
FEAT_PAD = 128   # feature dims padded to a multiple of this (lane-dense)
USE_BF16 = True  # bf16 operands for the big matmuls (f32 accumulation)


# ----------------------------------------------------------------------------
# helpers
# ----------------------------------------------------------------------------
def _round_up(x, m):
    return ((x + m - 1) // m) * m


def _pick_tile(dim, pref):
    """Largest 128-multiple tile <= pref that divides dim (or the full dim).

    All callers pre-pad dims to multiples of 128, so the fallback (128) is
    always lane-dense and divides dim.
    """
    if dim <= pref:
        return dim
    start = (pref // 128) * 128
    for t in range(start, 127, -128):
        if dim % t == 0:
            return t
    return 128


def _pad2(a, rows, cols):
    return jnp.pad(a, ((0, rows - a.shape[0]), (0, cols - a.shape[1])))


# ----------------------------------------------------------------------------
# Pallas kernels
# ----------------------------------------------------------------------------
def _matmul_fused_kernel(a_ref, b_ref, bias_ref, o_ref, *scratch, input_relu,
                         relu, log_softmax, valid_cols, b_resident, tk,
                         acc_in_out):
    """out = [relu](A) @ B + bias, with optional fused ReLU / masked log_softmax.

    If acc_in_out, accumulation happens directly in the (k-resident) output
    block; otherwise a VMEM f32 scratch accumulator is used.
    If b_resident, the whole (K, tn) B slab lives in VMEM and is sliced here.
    """
    k = pl.program_id(2)
    acc_ref = o_ref if acc_in_out else scratch[0]

    @pl.when(k == 0)
    def _init():
        acc_ref[...] = jnp.zeros_like(acc_ref)

    a = a_ref[...]
    if input_relu:
        a = jnp.maximum(a, jnp.zeros((), a.dtype))
    if b_resident:
        off = pl.multiple_of(k * tk, tk)
        b = b_ref[pl.ds(off, tk), :]
    else:
        b = b_ref[...]
    if a.dtype != b.dtype:           # e.g. f32 activations x bf16 weights
        a = a.astype(b.dtype)
    acc_ref[...] += jnp.dot(a, b, preferred_element_type=jnp.float32)

    @pl.when(k == pl.num_programs(2) - 1)
    def _finish():
        out = acc_ref[...] + bias_ref[...].astype(jnp.float32)
        if relu:
            out = jnp.maximum(out, 0.0)
        if log_softmax:
            cols = jax.lax.broadcasted_iota(jnp.int32, out.shape, 1)
            valid = cols < valid_cols
            xm = jnp.where(valid, out, -jnp.inf)
            m = jnp.max(xm, axis=-1, keepdims=True)
            s = xm - m
            denom = jnp.sum(jnp.where(valid, jnp.exp(s), 0.0),
                            axis=-1, keepdims=True)
            out = jnp.where(valid, s - jnp.log(denom), 0.0)
        o_ref[...] = out.astype(o_ref.dtype)


def _log_softmax_kernel(x_ref, o_ref, *, valid_cols):
    """Row-wise log_softmax with masking of padded (lane) class columns."""
    x = x_ref[...].astype(jnp.float32)
    cols = jax.lax.broadcasted_iota(jnp.int32, x.shape, 1)
    valid = cols < valid_cols
    xm = jnp.where(valid, x, -jnp.inf)
    m = jnp.max(xm, axis=-1, keepdims=True)
    s = xm - m
    denom = jnp.sum(jnp.where(valid, jnp.exp(s), 0.0), axis=-1, keepdims=True)
    o_ref[...] = jnp.where(valid, s - jnp.log(denom), 0.0).astype(o_ref.dtype)


# ----------------------------------------------------------------------------
# cached wrappers (one compile per unique configuration)
# ----------------------------------------------------------------------------
_MM_CACHE = {}
_LS_CACHE = {}


def matmul_fused(a, b, bias=None, *, input_relu=False, relu=False,
                 log_softmax=False, valid_cols=None, out_dtype=jnp.float32,
                 tm_pref=512, tk_pref=512, tn_pref=None,
                 b_resident_budget=8 * 1024 * 1024):
    m, k = a.shape
    k2, n = b.shape
    assert k == k2, (a.shape, b.shape)
    assert m % 128 == 0 and k % 128 == 0 and n % 128 == 0, (a.shape, b.shape)

    if bias is None:
        bias = jnp.zeros((1, n), jnp.float32)
    else:
        bias = bias.reshape(1, n).astype(jnp.float32)

    tm = _pick_tile(m, tm_pref)
    # Megacore (v7x has 2 TCs): keep >=2 blocks on the parallel M axis.
    if m // tm < 2 and m >= 256:
        tm = _pick_tile(m, m // 2)
    tk = _pick_tile(k, tk_pref)
    if log_softmax:
        # fused log_softmax needs the whole row in one tile; guard the width
        assert n <= 2048, f"fused log_softmax limited to n<=2048, got {n}"
        tn = n
    elif tn_pref is None:
        tn = n if n <= 1024 else _pick_tile(n, 512)
    else:
        tn = _pick_tile(n, tn_pref)

    # Keep B (the `support` matrix) fully K-resident in VMEM when it is small
    # enough: it is then streamed from HBM once instead of once per M tile.
    b_resident = (k > tk) and (k * tn * b.dtype.itemsize <= b_resident_budget)
    acc_in_out = (jnp.dtype(out_dtype) == jnp.dtype(jnp.float32))
    vcols = n if valid_cols is None else int(valid_cols)

    key = (m, k, n, str(a.dtype), str(b.dtype), str(jnp.dtype(out_dtype)),
           input_relu, relu, log_softmax, vcols, tm, tk, tn, b_resident)
    fn = _MM_CACHE.get(key)
    if fn is None:
        grid = (m // tm, n // tn, k // tk)
        kernel = functools.partial(
            _matmul_fused_kernel,
            input_relu=input_relu, relu=relu, log_softmax=log_softmax,
            valid_cols=vcols, b_resident=b_resident, tk=tk,
            acc_in_out=acc_in_out)

        if b_resident:
            b_spec = pl.BlockSpec((k, tn), lambda i, j, kk: (0, j))
        else:
            b_spec = pl.BlockSpec((tk, tn), lambda i, j, kk: (kk, j))

        scratch = [] if acc_in_out else [pltpu.VMEM((tm, tn), jnp.float32)]

        out_itemsize = jnp.dtype(out_dtype).itemsize
        cost = pl.CostEstimate(
            flops=2 * m * n * k,
            transcendentals=(m * n) if log_softmax else 0,
            bytes_accessed=(m * k * a.dtype.itemsize + k * n * b.dtype.itemsize
                            + n * 4 + m * n * out_itemsize))

        fn = jax.jit(pl.pallas_call(
            kernel,
            out_shape=jax.ShapeDtypeStruct((m, n), out_dtype),
            grid_spec=pltpu.PrefetchScalarGridSpec(
                num_scalar_prefetch=0,
                grid=grid,
                in_specs=[
                    pl.BlockSpec((tm, tk), lambda i, j, kk: (i, kk)),
                    b_spec,
                    pl.BlockSpec((1, tn), lambda i, j, kk: (0, j)),
                ],
                out_specs=pl.BlockSpec((tm, tn), lambda i, j, kk: (i, j)),
                scratch_shapes=scratch,
            ),
            compiler_params=pltpu.CompilerParams(
                dimension_semantics=("parallel", "parallel", "arbitrary")),
            cost_estimate=cost,
        ))
        _MM_CACHE[key] = fn
    return fn(a, b, bias)


def log_softmax_padded(x, valid_cols):
    m, n = x.shape
    tm = _pick_tile(m, 512)
    key = (m, n, str(x.dtype), int(valid_cols), tm)
    fn = _LS_CACHE.get(key)
    if fn is None:
        kernel = functools.partial(_log_softmax_kernel, valid_cols=int(valid_cols))
        fn = jax.jit(pl.pallas_call(
            kernel,
            out_shape=jax.ShapeDtypeStruct((m, n), jnp.float32),
            grid_spec=pltpu.PrefetchScalarGridSpec(
                num_scalar_prefetch=0,
                grid=(m // tm,),
                in_specs=[pl.BlockSpec((tm, n), lambda i: (i, 0))],
                out_specs=pl.BlockSpec((tm, n), lambda i: (i, 0)),
            ),
            compiler_params=pltpu.CompilerParams(
                dimension_semantics=("parallel",)),
        ))
        _LS_CACHE[key] = fn
    return fn(x)


def gcn_layer(x_pad, adj_c, w_pad, b_pad, *, input_relu=False, relu=False,
              log_softmax=False, valid_cols=None, out_dtype=jnp.float32):
    """GraphConvolution: out = adj @ (x @ W) + b, two tiled matmul calls."""
    support_dtype = jnp.bfloat16 if USE_BF16 else jnp.float32
    # (1) support = x @ W, computed exactly once (bf16 in, f32 accumulate)
    support = matmul_fused(x_pad, w_pad, bias=None, input_relu=input_relu,
                           out_dtype=support_dtype)
    # (2) out = adj @ support + b  (bf16 operands, f32 accumulate, fused epi)
    return matmul_fused(adj_c, support, bias=b_pad, relu=relu,
                        log_softmax=log_softmax, valid_cols=valid_cols,
                        out_dtype=out_dtype)


# ----------------------------------------------------------------------------
# parameters (padded; nn.Linear weights pre-transposed once at init)
# ----------------------------------------------------------------------------
def init_gcn_params(key, nfeat, nhid, nclass):
    f_pad = _round_up(nfeat, FEAT_PAD)
    h_pad = _round_up(nhid, FEAT_PAD)
    c_pad = _round_up(nclass, FEAT_PAD)
    fc3_out = 128  # already lane-aligned

    ks = jax.random.split(key, 10)
    s = 0.1
    nrm = lambda k, shape: jax.random.normal(k, shape, jnp.float32) * s
    wdt = jnp.bfloat16 if USE_BF16 else jnp.float32

    params = {
        # GraphConvolution weights [in, out], zero-padded, stored in bf16
        "gc1_w": _pad2(nrm(ks[0], (nfeat, nhid)), f_pad, h_pad).astype(wdt),
        "gc1_b": _pad2(nrm(ks[1], (1, nhid)), 1, h_pad),
        "gc2_w": _pad2(nrm(ks[2], (nhid, nclass)), h_pad, c_pad).astype(wdt),
        "gc2_b": _pad2(nrm(ks[3], (1, nclass)), 1, c_pad),
        "gc3_w": _pad2(nrm(ks[4], (nhid, nhid)), h_pad, h_pad).astype(wdt),
        "gc3_b": _pad2(nrm(ks[5], (1, nhid)), 1, h_pad),
        # nn.Linear weights stored pre-transposed ([in, out]) and zero-padded
        "fc3_wt": _pad2(nrm(ks[6], (fc3_out, nclass)).T, c_pad, fc3_out),
        "fc3_b": nrm(ks[7], (1, fc3_out)),
        "fc6_wt": _pad2(nrm(ks[8], (nclass, nhid)).T, h_pad, c_pad),
        "fc6_b": _pad2(nrm(ks[9], (1, nclass)), 1, c_pad),
    }
    meta = {"nfeat": nfeat, "nhid": nhid, "nclass": nclass,
            "f_pad": f_pad, "h_pad": h_pad, "c_pad": c_pad, "fc3_out": fc3_out}
    return params, meta


def prepare_inputs(x, adj, f_pad):
    """Pad + cast x and the N^2 adjacency ONCE; reuse across every forward."""
    n = x.shape[0]
    n_pad = _round_up(n, NODE_PAD)
    dt = jnp.bfloat16 if USE_BF16 else jnp.float32
    xp = _pad2(x.astype(jnp.float32), n_pad, f_pad).astype(dt)
    adj_c = _pad2(adj.astype(jnp.float32), n_pad, n_pad).astype(dt)
    return xp, adj_c, n


# ----------------------------------------------------------------------------
# GCN forward (eval mode -> dropout is identity)
# ----------------------------------------------------------------------------
def gcn_forward(params, meta, xp, adj_c, n, encoder_type):
    nhid, nclass, fc3_out = meta["nhid"], meta["nclass"], meta["fc3_out"]
    hdt = jnp.bfloat16 if USE_BF16 else jnp.float32

    if encoder_type == 0:
        h = gcn_layer(xp, adj_c, params["gc1_w"], params["gc1_b"],
                      relu=True, out_dtype=hdt)
        logits = gcn_layer(h, adj_c, params["gc2_w"], params["gc2_b"])
        log_probs = log_softmax_padded(logits, nclass)
        # out = fc3(relu(logits)); relu fused into the linear kernel prologue
        out = matmul_fused(logits, params["fc3_wt"], bias=params["fc3_b"],
                           input_relu=True)
        return log_probs[:n, :nclass], out[:n, :fc3_out]

    elif encoder_type == 1:
        h = gcn_layer(xp, adj_c, params["gc1_w"], params["gc1_b"],
                      relu=True, out_dtype=hdt)
        out = gcn_layer(h, adj_c, params["gc3_w"], params["gc3_b"])
        # logits = fc6(relu(out)); relu + log_softmax fused into the linear
        log_probs = matmul_fused(out, params["fc6_wt"], bias=params["fc6_b"],
                                 input_relu=True, log_softmax=True,
                                 valid_cols=nclass)
        return log_probs[:n, :nclass], out[:n, :nhid]

    elif encoder_type == 2:
        out = gcn_layer(xp, adj_c, params["gc1_w"], params["gc1_b"])
        # relu(out) fused into gc2's support matmul; log_softmax fused into gc2
        log_probs = gcn_layer(out, adj_c, params["gc2_w"], params["gc2_b"],
                              input_relu=True, log_softmax=True,
                              valid_cols=nclass)
        return log_probs[:n, :nclass], out[:n, :nhid]

    else:
        # h = relu(gc1); out = spmm(adj, h); logits = fc6(out)
        h = gcn_layer(xp, adj_c, params["gc1_w"], params["gc1_b"],
                      relu=True, out_dtype=hdt)
        out = matmul_fused(adj_c, h)
        log_probs = matmul_fused(out, params["fc6_wt"], bias=params["fc6_b"],
                                 log_softmax=True, valid_cols=nclass)
        return log_probs[:n, :nclass], out[:n, :nhid]


# ----------------------------------------------------------------------------
# pure-JAX reference (same bf16-quantized weights, f32 math)
# ----------------------------------------------------------------------------
def ref_forward(params, meta, x, adj, enc):
    nfeat, nhid, nclass = meta["nfeat"], meta["nhid"], meta["nclass"]
    f32 = jnp.float32
    w1 = params["gc1_w"][:nfeat, :nhid].astype(f32)
    b1 = params["gc1_b"][:, :nhid].astype(f32)
    w2 = params["gc2_w"][:nhid, :nclass].astype(f32)
    b2 = params["gc2_b"][:, :nclass].astype(f32)
    w3 = params["gc3_w"][:nhid, :nhid].astype(f32)
    b3 = params["gc3_b"][:, :nhid].astype(f32)
    fc3_w = params["fc3_wt"][:nclass, :].astype(f32)
    fc3_b = params["fc3_b"].astype(f32)
    fc6_w = params["fc6_wt"][:nhid, :nclass].astype(f32)
    fc6_b = params["fc6_b"][:, :nclass].astype(f32)

    gc = lambda xx, w, b: adj @ (xx @ w) + b
    if enc == 0:
        h = jax.nn.relu(gc(x, w1, b1))
        logits = gc(h, w2, b2)
        out = jax.nn.relu(logits) @ fc3_w + fc3_b
        return jax.nn.log_softmax(logits, axis=1), out
    elif enc == 1:
        h = jax.nn.relu(gc(x, w1, b1))
        out = gc(h, w3, b3)
        logits = jax.nn.relu(out) @ fc6_w + fc6_b
        return jax.nn.log_softmax(logits, axis=1), out
    elif enc == 2:
        out = gc(x, w1, b1)
        logits = gc(jax.nn.relu(out), w2, b2)
        return jax.nn.log_softmax(logits, axis=1), out
    else:
        h = jax.nn.relu(gc(x, w1, b1))
        out = adj @ h
        logits = out @ fc6_w + fc6_b
        return jax.nn.log_softmax(logits, axis=1), out


# ----------------------------------------------------------------------------
# Demo
# ----------------------------------------------------------------------------
if __name__ == "__main__":
    N, NFEAT, NHID, NCLASS = 8, 16, 32, 8  # small synthetic graph
    key = jax.random.PRNGKey(0)
    k_params, k_x, k_adj = jax.random.split(key, 3)

    params, meta = init_gcn_params(k_params, NFEAT, NHID, NCLASS)

    x = jax.random.normal(k_x, (N, NFEAT), jnp.float32)
    # symmetric row-normalized dense adjacency with self loops
    a = (jax.random.uniform(k_adj, (N, N)) > 0.6).astype(jnp.float32)
    a = jnp.maximum(a, a.T) + jnp.eye(N, dtype=jnp.float32)
    adj = a / jnp.sum(a, axis=1, keepdims=True)

    # adjacency / feature pad + bf16 cast done ONCE, reused by every call
    xp, adj_c, n = prepare_inputs(x, adj, meta["f_pad"])

    ok = True

    # self-test of the multi-k / K-resident-B / accumulate-into-output path
    ka, kb = jax.random.split(jax.random.PRNGKey(1))
    ta = jax.random.normal(ka, (256, 256), jnp.float32)
    tb = jax.random.normal(kb, (256, 128), jnp.float32)
    tc = matmul_fused(ta, tb, tm_pref=128, tk_pref=128)
    jax.block_until_ready(tc)
    mm_err = float(jnp.max(jnp.abs(tc - ta @ tb)))
    if not mm_err < 1e-2:
        ok = False
        print(f"matmul self-test failed: max|diff|={mm_err:.5f}")

    for enc in (0, 1, 2, 3):
        log_probs, out = gcn_forward(params, meta, xp, adj_c, n, enc)
        jax.block_until_ready((log_probs, out))
        ref_lp, ref_out = ref_forward(params, meta, x, adj, enc)
        err_lp = float(jnp.max(jnp.abs(log_probs - ref_lp)))
        err_out = float(jnp.max(jnp.abs(out - ref_out)))
        # bf16 adjacency / support / activations -> loose tolerance
        if not (err_lp < 0.2 and err_out < 0.2):
            ok = False
            print(f"encoder {enc}: max|dlogp|={err_lp:.4f} "
                  f"max|dout|={err_out:.4f}")

    if ok:
        print("KERNEL_OK")
</pallas_src>

<mosaic_0001>
module attributes {stable_mosaic.version = 11 : i64} {
  func.func @_matmul_fused_kernel(%arg0: i32, %arg1: i32, %arg2: i32, %arg3: memref<128x128xf32, #tpu.memory_space<vmem>>, %arg4: memref<256x128xf32, #tpu.memory_space<vmem>>, %arg5: memref<1x128xf32, #tpu.memory_space<vmem>>, %arg6: memref<128x128xf32, #tpu.memory_space<vmem>>) attributes {dimension_semantics = [#tpu.dimension_semantics<parallel>, #tpu.dimension_semantics<parallel>, #tpu.dimension_semantics<arbitrary>], iteration_bounds = array<i64: 2, 1, 2>, scalar_prefetch = 0 : i64, scratch_operands = 0 : i64, tpu.core_type = #tpu.core_type<tc>, window_params = [{transform_indices = @transform_0, window_bounds = array<i64: 128, 128>}, {transform_indices = @transform_1, window_bounds = array<i64: 256, 128>}, {transform_indices = @transform_2, window_bounds = array<i64: 1, 128>}, {transform_indices = @transform_3, window_bounds = array<i64: 128, 128>}]} {
    %c0_i32 = arith.constant 0 : i32
    %0 = arith.cmpi eq, %arg2, %c0_i32 : i32
    %1 = arith.extui %0 : i1 to i32
    %c0_i32_0 = arith.constant 0 : i32
    %2 = arith.cmpi ne, %1, %c0_i32_0 : i32
    scf.if %2 {
      %cst_8 = arith.constant 0.000000e+00 : f32
      %15 = vector.broadcast %cst_8 : f32 to vector<128x128xf32>
      %c0_9 = arith.constant 0 : index
      %c0_10 = arith.constant 0 : index
      %16 = vector.load %arg6[%c0_9, %c0_10] : memref<128x128xf32, #tpu.memory_space<vmem>>, vector<128x128xf32>
      tpu.vector_store %arg6[%c0_9, %c0_10], %15 {strides = array<i32>} : memref<128x128xf32, #tpu.memory_space<vmem>>, vector<128x128xf32>,
    } else {
    }
    %c0 = arith.constant 0 : index
    %c0_1 = arith.constant 0 : index
    %3 = vector.load %arg3[%c0, %c0_1] : memref<128x128xf32, #tpu.memory_space<vmem>>, vector<128x128xf32>
    %c128_i32 = arith.constant 128 : i32
    %4 = arith.muli %arg2, %c128_i32 : i32
    %5 = tpu.assume_multiple %4, 128 : i32
    %6 = arith.index_cast %5 : i32 to index
    %c0_2 = arith.constant 0 : index
    %7 = vector.load %arg4[%6, %c0_2] : memref<256x128xf32, #tpu.memory_space<vmem>>, vector<128x128xf32>
    %c0_3 = arith.constant 0 : index
    %c0_4 = arith.constant 0 : index
    %8 = vector.load %arg6[%c0_3, %c0_4] : memref<128x128xf32, #tpu.memory_space<vmem>>, vector<128x128xf32>
    %cst = arith.constant dense<0.000000e+00> : vector<128x128xf32>
    %9 = tpu.matmul %3, %7, %cst {dimension_numbers = #tpu.dot_dimension_numbers<[1], [0], [0], [1], [0, 0, 1, 1], [], []>} : vector<128x128xf32>, vector<128x128xf32>, vector<128x128xf32> -> vector<128x128xf32>
    %10 = arith.addf %8, %9 : vector<128x128xf32>
    %c0_5 = arith.constant 0 : index
    %c0_6 = arith.constant 0 : index
    %11 = vector.load %arg6[%c0_5, %c0_6] : memref<128x128xf32, #tpu.memory_space<vmem>>, vector<128x128xf32>
    tpu.vector_store %arg6[%c0_5, %c0_6], %10 {strides = array<i32>} : memref<128x128xf32, #tpu.memory_space<vmem>>, vector<128x128xf32>,
    %c1_i32 = arith.constant 1 : i32
    %12 = arith.cmpi eq, %arg2, %c1_i32 : i32
    %13 = arith.extui %12 : i1 to i32
    %c0_i32_7 = arith.constant 0 : i32
    %14 = arith.cmpi ne, %13, %c0_i32_7 : i32
    scf.if %14 {
      %c0_8 = arith.constant 0 : index
      %c0_9 = arith.constant 0 : index
      %15 = vector.load %arg6[%c0_8, %c0_9] : memref<128x128xf32, #tpu.memory_space<vmem>>, vector<128x128xf32>
      %c0_10 = arith.constant 0 : index
      %c0_11 = arith.constant 0 : index
      %16 = vector.load %arg5[%c0_10, %c0_11] : memref<1x128xf32, #tpu.memory_space<vmem>>, vector<1x128xf32>
      %17 = vector.broadcast %16 : vector<1x128xf32> to vector<128x128xf32>
      %18 = arith.addf %15, %17 : vector<128x128xf32>
      %c0_12 = arith.constant 0 : index
      %c0_13 = arith.constant 0 : index
      %19 = vector.load %arg6[%c0_12, %c0_13] : memref<128x128xf32, #tpu.memory_space<vmem>>, vector<128x128xf32>
      tpu.vector_store %arg6[%c0_12, %c0_13], %18 {strides = array<i32>} : memref<128x128xf32, #tpu.memory_space<vmem>>, vector<128x128xf32>,
    } else {
    }
    return
  }
  func.func @transform_0(%arg0: i32, %arg1: i32, %arg2: i32) -> (i32, i32) {
    %c0_i32 = arith.constant 0 : i32
    return %arg0, %arg2 : i32, i32
  }
  func.func @transform_1(%arg0: i32, %arg1: i32, %arg2: i32) -> (i32, i32) {
    %c0_i32 = arith.constant 0 : i32
    %c0_i32_0 = arith.constant 0 : i32
    return %c0_i32, %arg1 : i32, i32
  }
  func.func @transform_2(%arg0: i32, %arg1: i32, %arg2: i32) -> (i32, i32) {
    %c0_i32 = arith.constant 0 : i32
    %c0_i32_0 = arith.constant 0 : i32
    return %c0_i32, %arg1 : i32, i32
  }
  func.func @transform_3(%arg0: i32, %arg1: i32, %arg2: i32) -> (i32, i32) {
    %c0_i32 = arith.constant 0 : i32
    return %arg0, %arg1 : i32, i32
  }
}

</mosaic_0001>

<bundles_post_ra>
// kernel: tpu_custom_call.1
= control target key start
LH: loop header
LB: loop body
LE: loop exit
PB: predicated region body
PF: predicated region fallthrough
CT: control target
= control target key end

     0   :  { %s1583_s0 = inlined_call_operand.hbm [shape: f32[256,256], index: 0, kind: input, shape index: {}]   ;;  %s1584_s1 = inlined_call_operand.hbm [shape: f32[256,128], index: 1, kind: input, shape index: {}]   ;;  %s1585_s2 = inlined_call_operand.vmem [shape: f32[1,128], index: 2, kind: input, shape index: {}]   ;;  %s1586_s3 = inlined_call_operand.hbm [shape: f32[256,128], index: 3, kind: output, shape index: {}]  }
   0x1   :  { %1600 = sst [smem:[#allocation16_spill]] %s1584_s1 }
   0x2   :  { %8 = vsyncpa [#allocation3], 0 }
   0x3   :  { %10 = vsyncpa [#allocation3 + $0x1], 0 }
   0x4   :  { %11 = vsyncpa [#allocation6], 0 }
   0x5   :  { %12 = vsyncpa [#allocation4], 0 }
   0x6   :  { %14 = vsyncpa [#allocation4 + $0x1], 0  ;;  %s1185_s12 = smov 0   ;;  %s1187_s13 = smov 0  }
   0x7   :  { %s1189_s14 = smov 0   ;;  %s1191_s15 = smov 0  }
   0x8   :  { %s1193_s16 = smov 0   ;;  %s1195_s17 = smov 0  }
   0x9   :  { %s1197_s18 = smov 0   ;;  %s1199_s19 = smov 0  }
   0xa   :  { %s1201_s20 = smov 0   ;;  %s1203_s21 = smov 0  }
   0xb   :  { %s1205_s22 = smov 0  }
   0xc LB: > { %1601 = sst [smem:[#allocation11_spill]] %s1114_s12  ;;  %s690_s23 = sadd.s32 4294967295, %s1154_s22   ;;  %s1154_s22 = sphi %s1205_s22, %s20_s22   ;;  %s1150_s21 = sphi %s1203_s21, %s1637_s21   ;;  %s1146_s20 = sphi %s1201_s20, %s1628_s20   ;;  %s1142_s19 = sphi %s1199_s19, %s1636_s19   ;;  %s1138_s18 = sphi %s1197_s18, %s1627_s18   ;;  %s1134_s17 = sphi %s1195_s17, %s1635_s17   ;;  %s1130_s16 = sphi %s1193_s16, %s1634_s16   ;;  %s1126_s15 = sphi %s1191_s15, %s1633_s15   ;;  %s1122_s14 = sphi %s1189_s14, %s1632_s14   ;;  %s1118_s13 = sphi %s1187_s13, %s1631_s13   ;;  %s1114_s12 = sphi %s1185_s12, %s1630_s12  }
   0xd   : > { %1602 = sst [smem:[#allocation12_spill]] %s1146_s20  ;;  %s691_s24 = sadd.s32 4294967294, %s1154_s22  }
   0xe   : > { %p55_p0 = scmp.ne.s32.totalorder %s1134_s17, %s1130_s16  ;;  %p56_p1 = scmp.eq.s32.totalorder %s1154_s22, 0 }
   0xf   : > { %p61_p2 = scmp.ne.s32.totalorder %s1130_s16, %s1126_s15  ;;  %p1245_p3 = scmp.eq.s32.totalorder %s690_s23, 0 }
  0x10   : > { %p1250_p4 = por %p56_p1, %p55_p0  ;;  %p138_p5 = scmp.ne.s32.totalorder %s1122_s14, %s1118_s13 }
  0x11   : > { %s1603_s26 = scalar_select %p1245_p3, 1, 0 }
  0x12   : > { %p1258_p6 = por %p1245_p3, %p61_p2  ;;  %p139_p7 = scmp.eq.s32.totalorder %s690_s23, 3 }
  0x13   : > { %p144_p8 = scmp.ne.s32.totalorder %s1118_s13, %s1114_s12  ;;  %p145_p9 = scmp.eq.s32.totalorder %s691_s24, 3 }
  0x14   : > { %s1605_s29 = scalar_select %p1258_p6, 1, 0 }
  0x15   : > { %p1264_p10 = por %p139_p7, %p138_p5  ;;  %p692_p11 = scmp.ge.s32.totalorder %s1154_s22, 1 }
  0x16   : > { %p1269_p12 = por %p145_p9, %p144_p8  ;;  %p152_p13 = scmp.lt.s32.totalorder %s1154_s22, 5 }
  0x17   : > { %s1606_s30 = scalar_select %p1264_p10, 1, 0 }
  0x18   : > { %s1607_s4 = scalar_select %p1269_p12, 1, 0 }
  0x19   : > { %p1274_p0 = pnand %p692_p11, %p152_p13  ;;  %s1156_s6 = smov [#allocation5]  }
  0x1a   : > { %1608 = sst [smem:[#allocation13_spill]] %s1607_s4  ;;  %s166_s7 = sshll.u32 %s1156_s6, 4  ;;  %s167_s7 = int_to_ptr.vmem [resolvable:$true] %s166_s7 }
  0x1b   : > { %s1609_s5 = scalar_select %p1274_p0, 1, 0 }
  0x1c   : > { %p859_p1 = pneg %p1274_p0  ;;  %p872_p2 = scmp.lt.s32.totalorder %s1154_s22, 4 }
  0x1d   : > { %s1612_s1 = sld [smem:[#allocation16_spill]] }
  0x1e   : > { %p1283_p5 = pnand %p859_p1, %p1245_p3  ;;  %p1289_p7 = pnand %p872_p2, %p1250_p4 }
  0x20   : > { %s1611_s9 = scalar_select %p1289_p7, 1, 0 }
  0x21   : > { %p972_p9 = pneg %p1283_p5 }
  0x23   : > { %s970_s15 = scalar_lea.hbm %s1612_s1, 4096 }
  0x24   : > { %p971_p8 = scmp.ne.s32.totalorder %s1612_s1, %s970_s15  ;;  %p977_p1 = scmp.lt.u32.totalorder %s970_s15, %s1612_s1 }
  0x26   : > { %p973_p11 = pnand %p972_p9, %p971_p8 }
  0x28   : > { %p974_p13 = pneg %p973_p11 }
  0x2a   : > { %p979_p4 = pnand %p977_p1, %p974_p13 }
  0x2c   : > { %982 = shalt.err (!%p979_p4)
}
  0x2d   : > { %s983_s28 = scalar_lea.vmem %s167_s7, 4096  ;;  %p991_p3 = scmp.lt.s32.totalorder %s167_s7, %s167_s7 }
  0x2e   : > { %p984_p2 = scmp.ne.s32.totalorder %s167_s7, %s983_s28  ;;  %p992_p6 = scmp.lt.s32.totalorder %s983_s28, %s983_s28 }
  0x30   : > { %p986_p12 = pnand %p984_p2, %p972_p9  ;;  %p993_p0 = por %p992_p6, %p991_p3 }
  0x32   : > { %p987_p10 = pneg %p986_p12 }
  0x34   : > { %p994_p7 = pnand %p993_p0, %p987_p10 }
  0x36   : > { %997 = shalt.err (!%p994_p7)
}
  0x37   : > { %s1594_s10 = smov 128   ;;  %s1595_s25 = smov 8  }
  0x38   : > { %862 = dma.hbm_to_vmem [thread:$0]  (!%p1283_p5), %s1612_s1, 4096, %s167_s7, [#allocation6], %s1594_s10, %s1594_s10, %s1595_s25  }
  0x39   : > { %s32_s23 = sadd.s32 1, %s1146_s20  ;;  %s39_s24 = sadd.s32 1, %s1150_s21 }
  0x3a   : > { %p33_p3 = scmp.ge.s32.totalorder %s32_s23, 2  ;;  %s186_s6 = sand.u32 1, %s1134_s17  }
  0x3b   : > { %s696_s28 = sshll.u32 %s186_s6, 7  ;;  %s713_s27 = sshll.u32 %s1150_s21, 5 }
  0x3c   : > { %s1639_s23 = smov (%p33_p3, %s32_s23), 0  ;;  %s1641_s24 = smov (!%p33_p3, %s39_s24), %s1150_s21 }
  0x3d   : > { %1613 = sst [smem:[#allocation14_spill]] %s1639_s23  ;;  %s44_s8 = ssub.s32 %s1146_s20, %s1639_s23 }
  0x3e   : > { %p41_p6 = scmp.ge.s32.totalorder %s1641_s24, 2  ;;  %s196_s4 = sadd.s32 %s1146_s20, %s713_s27 }
  0x3f   : > { %s190_s7 = scalar_lea.vmem [#allocation2], %s696_s28  ;;  %s699_s15 = sshll.u32 %s196_s4, 7 }
  0x40   : > { %s199_s11 = sshll.u32 %s190_s7, 4  ;;  %s1643_s24 = smov (%p41_p6, %s1641_s24), 0  ;;  %s1324_s11 = int_to_ptr.vmem [resolvable:$true] %s199_s11 }
  0x41   : > { %1614 = sst [smem:[#allocation15_spill]] %s1643_s24  ;;  %s43_s10 = ssub.s32 %s1150_s21, %s1643_s24 }
  0x42   : > { %s1331_s12 = scalar_lea.hbm %s1583_s0, %s699_s15  ;;  %s45_s27 = sor.u32 %s44_s8, %s43_s10 }
  0x43   : > { %p126_p10 = scmp.eq.s32.totalorder %s43_s10, 0  ;;  %p46_p12 = scmp.eq.s32.totalorder %s45_s27, 0 }
  0x44   : > { %s1615_s28 = sadd.s32 1, %s1122_s14  ;;  %s1616_s23 = sadd.s32 1, %s1134_s17 }
  0x45   : > { %s1336_s7 = scalar_select %p126_p10, %s1122_s14, %s1615_s28  }
  0x46   : > { %s1341_s4 = scalar_select %p46_p12, %s1134_s17, %s1616_s23  }
  0x47   : > { %s1343_s20 = scalar_lea.sflag [#allocation3], %s186_s6  ;;  %s998_s24 = scalar_lea.hbm %s1331_s12, 2048 }
  0x48   : > { %p999_p0 = scmp.ne.s32.totalorder %s1331_s12, %s998_s24  ;;  %p1617_p5 = scmp.ne.s32.totalorder %s1611_s9, 0 }
  0x49   : > { %s1003_s10 = scalar_lea.hbm %s1583_s0, 8192  ;;  %p1004_p11 = scmp.lt.u32.totalorder %s1331_s12, %s1583_s0 }
  0x4a   : > { %p1000_p7 = pneg %p1617_p5  ;;  %p1005_p13 = scmp.lt.u32.totalorder %s1003_s10, %s998_s24 }
  0x4b   : > { %p1007_p4 = scmp.lt.u32.totalorder %s998_s24, %s1331_s12 }
  0x4c   : > { %p1001_p8 = pnand %p1000_p7, %p999_p0  ;;  %p1006_p1 = por %p1005_p13, %p1004_p11 }
  0x4e   : > { %p1002_p9 = pneg %p1001_p8  ;;  %p1008_p2 = por %p1007_p4, %p1006_p1 }
  0x50   : > { %p1009_p3 = pnand %p1008_p2, %p1002_p9 }
  0x52   : > { %1012 = shalt.err (!%p1009_p3)
}
  0x53   : > { %s1013_s23 = scalar_lea.vmem %s1324_s11, 2048  ;;  %s1159_s6 = smov [#allocation2]  }
  0x54   : > { %p1014_p6 = scmp.ne.s32.totalorder %s1324_s11, %s1013_s23  ;;  %s1018_s27 = sshll.u32 %s1159_s6, 4  ;;  %s1019_s27 = int_to_ptr.vmem [resolvable:$false] %s1018_s27 }
  0x55   : > { %s1020_s28 = scalar_lea.vmem %s1019_s27, 4096  ;;  %p1021_p0 = scmp.lt.s32.totalorder %s1324_s11, %s1019_s27 }
  0x56   : > { %p1016_p10 = pnand %p1014_p6, %p1000_p7  ;;  %p1022_p8 = scmp.lt.s32.totalorder %s1020_s28, %s1013_s23 }
  0x58   : > { %p1017_p12 = pneg %p1016_p10  ;;  %p1023_p11 = por %p1022_p8, %p1021_p0 }
  0x5a   : > { %p1024_p13 = pnand %p1023_p11, %p1017_p12 }
  0x5c   : > { %1027 = shalt.err (!%p1024_p13)
}
  0x5d   : > { %s1160_s24 = smov 256   ;;  %s1618_s1 = smov 8  }
  0x5e   : > { %s1619_s25 = smov 128   ;;  %p1620_p7 = scmp.ne.s32.totalorder %s1609_s5, 0 }
  0x5f   : > { %866 = dma.hbm_to_vmem [thread:$0]  (!%p1617_p5), %s1331_s12, 2048, %s1324_s11, %s1343_s20, %s1160_s24, %s1619_s25, %s1618_s1  }
  0x60   : > { %211 = sbr.rel (%p1620_p7) target bundleno = 420 (0x1a4), region = 32  ;;  %s213_s10 = sand.u32 (!%p1620_p7), 1, %s1130_s16  }
  0x61   : > { %s701_s8 = sshll.u32 (!%p1620_p7), %s213_s10, 7  ;;  %s214_s15 = scalar_lea.sflag (!%p1620_p7), [#allocation3], %s213_s10 }
  0x62   : > { %s1376_s23 = scalar_lea.vmem (!%p1620_p7), [#allocation2], %s701_s8  ;;  %p1621_p9 = scmp.ne.s32.totalorder (!%p1620_p7), %s1605_s29, 0 }
  0x67   : > { %1101 = dma.done.wait (%p1621_p9), %s214_s15, 2048  }
  0x68   : > { %1103 = vsyncadd (%p1621_p9), %s214_s15, 4294965248  ;;  %p1622_p1 = scmp.ne.s32.totalorder %s1603_s26, 0 }
  0x6a   : > { %1105 = dma.done.wait (%p1622_p1), [#allocation6], 4096  }
  0x6b   : > { %1107 = vsyncadd (%p1622_p1), [#allocation6], 4294963200  ;;  %s244_s12 = sand.u32 1, %s1118_s13   ;;  %p704_p5 = scmp.ne.s32.totalorder %s1138_s18, 0 }
  0x6c   : > { %s703_s20 = sshll.u32 %s244_s12, 7  ;;  %v1161_v0 = vmov (!%p704_p5), 0.0  }
  0x6d   : > { %s1389_s5 = scalar_lea.vmem [#allocation7], %s703_s20  ;;  %255 = sbr.rel (%p704_p5) target bundleno = 118 (0x76), region = 44 }
  0x6e   : > { %256 = vst [vmem:[%s1389_s5] sm:$0xff] (!%p704_p5), %v1161_v0  ;;  %257 = vst [vmem:[%s1389_s5 + $0x8] sm:$0xff] (!%p704_p5), %v1161_v0 }
  0x6f   : > { %258 = vst [vmem:[%s1389_s5 + $0x10] sm:$0xff] (!%p704_p5), %v1161_v0  ;;  %259 = vst [vmem:[%s1389_s5 + $0x18] sm:$0xff] (!%p704_p5), %v1161_v0 }
  0x70   : > { %260 = vst [vmem:[%s1389_s5 + $0x20] sm:$0xff] (!%p704_p5), %v1161_v0  ;;  %261 = vst [vmem:[%s1389_s5 + $0x28] sm:$0xff] (!%p704_p5), %v1161_v0 }
  0x71   : > { %262 = vst [vmem:[%s1389_s5 + $0x30] sm:$0xff] (!%p704_p5), %v1161_v0  ;;  %263 = vst [vmem:[%s1389_s5 + $0x38] sm:$0xff] (!%p704_p5), %v1161_v0 }
  0x72   : > { %264 = vst [vmem:[%s1389_s5 + $0x40] sm:$0xff] (!%p704_p5), %v1161_v0  ;;  %265 = vst [vmem:[%s1389_s5 + $0x48] sm:$0xff] (!%p704_p5), %v1161_v0 }
  0x73   : > { %266 = vst [vmem:[%s1389_s5 + $0x50] sm:$0xff] (!%p704_p5), %v1161_v0  ;;  %267 = vst [vmem:[%s1389_s5 + $0x58] sm:$0xff] (!%p704_p5), %v1161_v0 }
  0x74   : > { %268 = vst [vmem:[%s1389_s5 + $0x60] sm:$0xff] %v1161_v0  ;;  %269 = vst [vmem:[%s1389_s5 + $0x68] sm:$0xff] %v1161_v0 }
  0x75   : > { %270 = vst [vmem:[%s1389_s5 + $0x70] sm:$0xff] %v1161_v0  ;;  %271 = vst [vmem:[%s1389_s5 + $0x78] sm:$0xff] %v1161_v0 }
  0x76 PF: > { %s705_s26 = sshll.u32 %s1138_s18, 7  ;;  %v272_v1 = vld [vmem:[%s1376_s23] sm:$0xff]  ;;  %v273_v27 = vld [vmem:[%s1376_s23 + $0x8] sm:$0xff]  ;;  %v274_v29 = vld [vmem:[%s1376_s23 + $0x10] sm:$0xff]  ;;  %p706_p4 = scmp.ne.s32.totalorder %s1138_s18, 1 }
  0x77   : > { %v280_v2 = vld [vmem:[%s1376_s23 + $0x40] sm:$0xff]  ;;  %779 = vmatprep.mubr.f32.mxu0 %v272_v1  ;;  %s1411_s29 = scalar_lea.vmem [#allocation5], %s705_s26  ;;  %v281_v28 = vld [vmem:[%s1376_s23 + $0x48] sm:$0xff]  ;;  %v282_v30 = vld [vmem:[%s1376_s23 + $0x50] sm:$0xff] }
  0x78   : > { %791 = vmatprep.mubr.f32.mxu1 %v280_v2  ;;  %v290_v3 = vld [vmem:[%s1411_s29] sm:$0xff]  ;;  %v291_v4 = vld [vmem:[%s1411_s29 + $0x8] sm:$0xff]  ;;  %v292_v5 = vld [vmem:[%s1411_s29 + $0x10] sm:$0xff] }
  0x79   : > { %v803_v6 = vpack.c.bf16 %v291_v4, %v290_v3  ;;  %v293_v7 = vld [vmem:[%s1411_s29 + $0x18] sm:$0xff]  ;;  %v294_v9 = vld [vmem:[%s1411_s29 + $0x20] sm:$0xff]  ;;  %v295_v10 = vld [vmem:[%s1411_s29 + $0x28] sm:$0xff] }
  0x7a   : > { %v807_v8 = vpack.c.bf16 %v293_v7, %v292_v5  ;;  %v811_v11 = vpack.c.bf16 %v295_v10, %v294_v9  ;;  %v296_v12 = vld [vmem:[%s1411_s29 + $0x30] sm:$0xff]  ;;  %v297_v13 = vld [vmem:[%s1411_s29 + $0x38] sm:$0xff]  ;;  %v298_v15 = vld [vmem:[%s1411_s29 + $0x40] sm:$0xff] }
  0x7b   : > { %804 = vmatprep.subr.bf16.mxu0 %v803_v6  ;;  %835 = vmatprep.subr.bf16.mxu1 %v803_v6  ;;  %v815_v14 = vpack.c.bf16 %v297_v13, %v296_v12  ;;  %v299_v16 = vld [vmem:[%s1411_s29 + $0x48] sm:$0xff]  ;;  %v300_v18 = vld [vmem:[%s1411_s29 + $0x50] sm:$0xff]  ;;  %v301_v19 = vld [vmem:[%s1411_s29 + $0x58] sm:$0xff] }
  0x7c   : > { %806 = vmatpush3.bf16.msra.mxu0 %v803_v6  ;;  %843 = vmatpush3.bf16.msra.mxu1 %v803_v6  ;;  %v819_v17 = vpack.c.bf16 %v299_v16, %v298_v15  ;;  %v823_v20 = vpack.c.bf16 %v301_v19, %v300_v18  ;;  %v302_v21 = vld [vmem:[%s1411_s29 + $0x60] sm:$0xff]  ;;  %v303_v22 = vld [vmem:[%s1411_s29 + $0x68] sm:$0xff]  ;;  %v304_v24 = vld [vmem:[%s1411_s29 + $0x70] sm:$0xff] }
  0x7d   : > { %808 = vmatprep.subr.bf16.mxu0 %v807_v8  ;;  %836 = vmatprep.subr.bf16.mxu1 %v807_v8  ;;  %v827_v23 = vpack.c.bf16 %v303_v22, %v302_v21  ;;  %v305_v25 = vld [vmem:[%s1411_s29 + $0x78] sm:$0xff]  ;;  %v276_v33 = vld [vmem:[%s1376_s23 + $0x20] sm:$0xff]  ;;  %v277_v35 = vld [vmem:[%s1376_s23 + $0x28] sm:$0xff] }
  0x7e   : > { %v831_v26 = vpack.c.bf16 %v305_v25, %v304_v24  ;;  %v275_v31 = vld [vmem:[%s1376_s23 + $0x18] sm:$0xff]  ;;  %v284_v34 = vld [vmem:[%s1376_s23 + $0x60] sm:$0xff]  ;;  %v285_v36 = vld [vmem:[%s1376_s23 + $0x68] sm:$0xff] }
  0x7f   : > { %v283_v32 = vld [vmem:[%s1376_s23 + $0x58] sm:$0xff]  ;;  %v278_v37 = vld [vmem:[%s1376_s23 + $0x30] sm:$0xff]  ;;  %v307_v41 = vld [vmem:[%s1389_s5 + $0x8] sm:$0xff] }
  0x80   : > { %810 = vmatpush3.bf16.msra.mxu0 %v807_v8  ;;  %844 = vmatpush3.bf16.msra.mxu1 %v807_v8  ;;  %v286_v38 = vld [vmem:[%s1376_s23 + $0x70] sm:$0xff]  ;;  %v279_v39 = vld [vmem:[%s1376_s23 + $0x38] sm:$0xff]  ;;  %v315_v42 = vld [vmem:[%s1389_s5 + $0x48] sm:$0xff] }
  0x81   : > { %812 = vmatprep.subr.bf16.mxu0 %v811_v11  ;;  %837 = vmatprep.subr.bf16.mxu1 %v811_v11  ;;  %v287_v40 = vld [vmem:[%s1376_s23 + $0x78] sm:$0xff]  ;;  %v306_v43 = vld [vmem:[%s1389_s5] sm:$0xff]  ;;  %v308_v55 = vld [vmem:[%s1389_s5 + $0x10] sm:$0xff] }
  0x82   : > { %v314_v44 = vld [vmem:[%s1389_s5 + $0x40] sm:$0xff]  ;;  %v309_v53 = vld [vmem:[%s1389_s5 + $0x18] sm:$0xff]  ;;  %v316_v56 = vld [vmem:[%s1389_s5 + $0x50] sm:$0xff] }
  0x83   : > { %v317_v54 = vld [vmem:[%s1389_s5 + $0x58] sm:$0xff]  ;;  %v311_v1 = vld [vmem:[%s1389_s5 + $0x28] sm:$0xff]  ;;  %v310_v3 = vld [vmem:[%s1389_s5 + $0x20] sm:$0xff] }
  0x84   : > { %814 = vmatpush3.bf16.msra.mxu0 %v811_v11  ;;  %845 = vmatpush3.bf16.msra.mxu1 %v811_v11  ;;  %v319_v2 = vld [vmem:[%s1389_s5 + $0x68] sm:$0xff]  ;;  %v318_v4 = vld [vmem:[%s1389_s5 + $0x60] sm:$0xff]  ;;  %v313_v13 = vld [vmem:[%s1389_s5 + $0x38] sm:$0xff] }
  0x85   : > { %816 = vmatprep.subr.bf16.mxu0 %v815_v14  ;;  %838 = vmatprep.subr.bf16.mxu1 %v815_v14  ;;  %v312_v15 = vld [vmem:[%s1389_s5 + $0x30] sm:$0xff] }
  0x86   : > { %v320_v16 = vld [vmem:[%s1389_s5 + $0x70] sm:$0xff] }
  0x88   : > { %818 = vmatpush3.bf16.msra.mxu0 %v815_v14  ;;  %846 = vmatpush3.bf16.msra.mxu1 %v815_v14  ;;  %v321_v14 = vld [vmem:[%s1389_s5 + $0x78] sm:$0xff] }
  0x89   : > { %820 = vmatprep.subr.bf16.mxu0 %v819_v17  ;;  %839 = vmatprep.subr.bf16.mxu1 %v819_v17 }
  0x8c   : > { %822 = vmatpush3.bf16.msra.mxu0 %v819_v17  ;;  %847 = vmatpush3.bf16.msra.mxu1 %v819_v17 }
  0x8d   : > { %824 = vmatprep.subr.bf16.mxu0 %v823_v20  ;;  %840 = vmatprep.subr.bf16.mxu1 %v823_v20 }
  0x90   : > { %826 = vmatpush3.bf16.msra.mxu0 %v823_v20  ;;  %848 = vmatpush3.bf16.msra.mxu1 %v823_v20 }
  0x91   : > { %828 = vmatprep.subr.bf16.mxu0 %v827_v23  ;;  %841 = vmatprep.subr.bf16.mxu1 %v827_v23 }
  0x94   : > { %830 = vmatpush3.bf16.msra.mxu0 %v827_v23  ;;  %849 = vmatpush3.bf16.msra.mxu1 %v827_v23 }
  0x95   : > { %832 = vmatprep.subr.bf16.mxu0 %v831_v26  ;;  %842 = vmatprep.subr.bf16.mxu1 %v831_v26 }
  0x98   : > { %834 = vmatpush3.bf16.msra.mxu0 %v831_v26  ;;  %850 = vmatpush3.bf16.msra.mxu1 %v831_v26  ;;  %v707_v26 = vld [vmem:[%s1585_s2] ss:$0 sm:$0xff] (!%p706_p4) }
  0x9b   : > { %780 = vmatmul.mubr.f32.vlgmr.msra.gmra.mrb[0].mxu0 %v273_v27  ;;  %792 = vmatmul.mubr.f32.vlgmr.msra.gmra.mrb[0].mxu1 %v281_v28 }
  0x9c   : > { %782 = vmatprep.mubr.f32.mxu0 %v274_v29  ;;  %794 = vmatprep.mubr.f32.mxu1 %v282_v30 }
  0x9f   : > { %783 = vmatmul.mubr.f32.gmra.mrb[2].mxu0 %v275_v31  ;;  %795 = vmatmul.mubr.f32.gmra.mrb[2].mxu1 %v283_v32 }
  0xa0   : > { %785 = vmatprep.mubr.f32.mxu0 %v276_v33  ;;  %797 = vmatprep.mubr.f32.mxu1 %v284_v34 }
  0xa3   : > { %786 = vmatmul.mubr.f32.gmra.mrb[4].mxu0 %v277_v35  ;;  %798 = vmatmul.mubr.f32.gmra.mrb[4].mxu1 %v285_v36 }
  0xa4   : > { %788 = vmatprep.mubr.f32.mxu0 %v278_v37  ;;  %800 = vmatprep.mubr.f32.mxu1 %v286_v38 }
  0xa7   : > { %789 = vmatmul.mubr.f32.gmra.mrb[6].mxu0 %v279_v39  ;;  %801 = vmatmul.mubr.f32.gmra.mrb[6].mxu1 %v287_v40 }
 0x16e   : > { %v781_v45 = vpop.f32.mrb[0].mxu0  ;;  %v793_v46 = vpop.f32.mrb[0].mxu1 }
 0x16f   : > { %v468_v47 = vadd.f32 %v781_v45, %v307_v41  ;;  %v476_v48 = vadd.f32 %v793_v46, %v315_v42  ;;  %v388_v49 = vpop.f32.mrb[1].mxu0  ;;  %v428_v50 = vpop.f32.mrb[1].mxu1 }
 0x170   : > { %v467_v51 = vadd.f32 %v388_v49, %v306_v43  ;;  %v475_v52 = vadd.f32 %v428_v50, %v314_v44 }
 0x171   : > { %484 = vst [vmem:[%s1389_s5 + $0x8] sm:$0xff] %v468_v47  ;;  %492 = vst [vmem:[%s1389_s5 + $0x48] sm:$0xff] %v476_v48 }
 0x172   : > { %483 = vst [vmem:[%s1389_s5] sm:$0xff] %v467_v51  ;;  %491 = vst [vmem:[%s1389_s5 + $0x40] sm:$0xff] %v475_v52  ;;  %v784_v57 = vpop.f32.mrb[2].mxu0  ;;  %v796_v58 = vpop.f32.mrb[2].mxu1 }
 0x173   : > { %v470_v59 = vadd.f32 %v784_v57, %v309_v53  ;;  %v478_v60 = vadd.f32 %v796_v58, %v317_v54  ;;  %v398_v61 = vpop.f32.mrb[3].mxu0  ;;  %v438_v62 = vpop.f32.mrb[3].mxu1 }
 0x174   : > { %v469_v63 = vadd.f32 %v398_v61, %v308_v55  ;;  %v477_v0 = vadd.f32 %v438_v62, %v316_v56 }
 0x175   : > { %486 = vst [vmem:[%s1389_s5 + $0x18] sm:$0xff] %v470_v59  ;;  %494 = vst [vmem:[%s1389_s5 + $0x58] sm:$0xff] %v478_v60 }
 0x176   : > { %485 = vst [vmem:[%s1389_s5 + $0x10] sm:$0xff] %v469_v63  ;;  %493 = vst [vmem:[%s1389_s5 + $0x50] sm:$0xff] %v477_v0  ;;  %v787_v5 = vpop.f32.mrb[4].mxu0  ;;  %v799_v6 = vpop.f32.mrb[4].mxu1 }
 0x177   : > { %v472_v7 = vadd.f32 %v787_v5, %v311_v1  ;;  %v480_v8 = vadd.f32 %v799_v6, %v319_v2  ;;  %v408_v9 = vpop.f32.mrb[5].mxu0  ;;  %v448_v10 = vpop.f32.mrb[5].mxu1 }
 0x178   : > { %v471_v11 = vadd.f32 %v408_v9, %v310_v3  ;;  %v479_v12 = vadd.f32 %v448_v10, %v318_v4  ;;  %502 = sbr.rel (%p706_p4) target bundleno = 394 (0x18a), region = 48  ;;  %v504_v27 = vld [vmem:[%s1389_s5 + $0x8] sm:$0xff] (!%p706_p4) }
 0x179   : > { %488 = vst [vmem:[%s1389_s5 + $0x28] sm:$0xff] %v472_v7  ;;  %496 = vst [vmem:[%s1389_s5 + $0x68] sm:$0xff] %v480_v8  ;;  %v503_v25 = vld [vmem:[%s1389_s5] sm:$0xff] (!%p706_p4)  ;;  %v527_v29 = vadd.f32 (!%p706_p4), %v707_v26, %v504_v27  ;;  %v512_v43 = vld [vmem:[%s1389_s5 + $0x48] sm:$0xff] (!%p706_p4) }
 0x17a   : > { %487 = vst [vmem:[%s1389_s5 + $0x20] sm:$0xff] %v471_v11  ;;  %495 = vst [vmem:[%s1389_s5 + $0x60] sm:$0xff] %v479_v12  ;;  %v790_v17 = vpop.f32.mrb[6].mxu0  ;;  %v802_v18 = vpop.f32.mrb[6].mxu1  ;;  %v526_v28 = vadd.f32 (!%p706_p4), %v707_v26, %v503_v25  ;;  %v511_v42 = vld [vmem:[%s1389_s5 + $0x40] sm:$0xff] (!%p706_p4)  ;;  %v535_v46 = vadd.f32 (!%p706_p4), %v707_v26, %v512_v43 }
 0x17b   : > { %v474_v19 = vadd.f32 %v790_v17, %v313_v13  ;;  %v482_v20 = vadd.f32 %v802_v18, %v321_v14  ;;  %v418_v21 = vpop.f32.mrb[7].mxu0  ;;  %v458_v22 = vpop.f32.mrb[7].mxu1  ;;  %543 = vst [vmem:[%s1389_s5 + $0x8] sm:$0xff] (!%p706_p4), %v527_v29  ;;  %v534_v45 = vadd.f32 (!%p706_p4), %v707_v26, %v511_v42 }
 0x17c   : > { %v473_v23 = vadd.f32 %v418_v21, %v312_v15  ;;  %v481_v24 = vadd.f32 %v458_v22, %v320_v16  ;;  %v506_v31 = vld [vmem:[%s1389_s5 + $0x18] sm:$0xff] (!%p706_p4)  ;;  %542 = vst [vmem:[%s1389_s5] sm:$0xff] (!%p706_p4), %v526_v28  ;;  %551 = vst [vmem:[%s1389_s5 + $0x48] sm:$0xff] (!%p706_p4), %v535_v46 }
 0x17d   : > { %490 = vst [vmem:[%s1389_s5 + $0x38] sm:$0xff] %v474_v19  ;;  %498 = vst [vmem:[%s1389_s5 + $0x78] sm:$0xff] %v482_v20  ;;  %v505_v30 = vld [vmem:[%s1389_s5 + $0x10] sm:$0xff] (!%p706_p4)  ;;  %v529_v34 = vadd.f32 (!%p706_p4), %v707_v26, %v506_v31  ;;  %v514_v48 = vld [vmem:[%s1389_s5 + $0x58] sm:$0xff] (!%p706_p4) }
 0x17e   : > { %489 = vst [vmem:[%s1389_s5 + $0x30] sm:$0xff] %v473_v23  ;;  %497 = vst [vmem:[%s1389_s5 + $0x70] sm:$0xff] %v481_v24  ;;  %v528_v33 = vadd.f32 (!%p706_p4), %v707_v26, %v505_v30  ;;  %v513_v44 = vld [vmem:[%s1389_s5 + $0x50] sm:$0xff] (!%p706_p4)  ;;  %v537_v51 = vadd.f32 (!%p706_p4), %v707_v26, %v514_v48 }
 0x17f   : > { %545 = vst [vmem:[%s1389_s5 + $0x18] sm:$0xff] %v529_v34  ;;  %v536_v47 = vadd.f32 %v707_v26, %v513_v44  ;;  %550 = vst [vmem:[%s1389_s5 + $0x40] sm:$0xff] %v534_v45 }
 0x180   : > { %v508_v36 = vld [vmem:[%s1389_s5 + $0x28] sm:$0xff]  ;;  %544 = vst [vmem:[%s1389_s5 + $0x10] sm:$0xff] %v528_v33  ;;  %553 = vst [vmem:[%s1389_s5 + $0x58] sm:$0xff] %v537_v51 }
 0x181   : > { %v507_v32 = vld [vmem:[%s1389_s5 + $0x20] sm:$0xff]  ;;  %v531_v39 = vadd.f32 %v707_v26, %v508_v36  ;;  %v516_v50 = vld [vmem:[%s1389_s5 + $0x68] sm:$0xff]  ;;  %552 = vst [vmem:[%s1389_s5 + $0x50] sm:$0xff] %v536_v47 }
 0x182   : > { %v530_v35 = vadd.f32 %v707_v26, %v507_v32  ;;  %v515_v49 = vld [vmem:[%s1389_s5 + $0x60] sm:$0xff]  ;;  %v539_v53 = vadd.f32 %v707_v26, %v516_v50 }
 0x183   : > { %547 = vst [vmem:[%s1389_s5 + $0x28] sm:$0xff] %v531_v39  ;;  %v538_v52 = vadd.f32 %v707_v26, %v515_v49 }
 0x184   : > { %v510_v38 = vld [vmem:[%s1389_s5 + $0x38] sm:$0xff]  ;;  %546 = vst [vmem:[%s1389_s5 + $0x20] sm:$0xff] %v530_v35  ;;  %555 = vst [vmem:[%s1389_s5 + $0x68] sm:$0xff] %v539_v53 }
 0x185   : > { %v509_v37 = vld [vmem:[%s1389_s5 + $0x30] sm:$0xff]  ;;  %v533_v41 = vadd.f32 %v707_v26, %v510_v38  ;;  %v518_v55 = vld [vmem:[%s1389_s5 + $0x78] sm:$0xff]  ;;  %554 = vst [vmem:[%s1389_s5 + $0x60] sm:$0xff] %v538_v52 }
 0x186   : > { %v532_v40 = vadd.f32 %v707_v26, %v509_v37  ;;  %v517_v54 = vld [vmem:[%s1389_s5 + $0x70] sm:$0xff]  ;;  %v541_v57 = vadd.f32 %v707_v26, %v518_v55 }
 0x187   : > { %549 = vst [vmem:[%s1389_s5 + $0x38] sm:$0xff] %v533_v41  ;;  %v540_v56 = vadd.f32 %v707_v26, %v517_v54 }
 0x188   : > { %548 = vst [vmem:[%s1389_s5 + $0x30] sm:$0xff] %v532_v40  ;;  %557 = vst [vmem:[%s1389_s5 + $0x78] sm:$0xff] %v541_v57 }
 0x189   : > { %556 = vst [vmem:[%s1389_s5 + $0x70] sm:$0xff] %v540_v56 }
 0x18a PF: > { %s714_s18 = sshll.u32 %s1142_s19, 11  ;;  %s573_s24 = sshll.u32 %s1389_s5, 4  ;;  %s1518_s24 = int_to_ptr.vmem [resolvable:$true] %s573_s24 }
 0x18b   : > { %s1515_s28 = scalar_lea.hbm %s1586_s3, %s714_s18  ;;  %s1522_s1 = scalar_lea.sflag [#allocation4], %s244_s12 }
 0x18c   : > { %s1028_s25 = scalar_lea.vmem %s1518_s24, 2048  ;;  %p1623_p3 = scmp.ne.s32.totalorder %s1606_s30, 0 }
 0x18d   : > { %p1029_p2 = scmp.ne.s32.totalorder %s1518_s24, %s1028_s25  ;;  %s1162_s19 = smov [#allocation7]  }
 0x18e   : > { %s1032_s10 = sshll.u32 %s1162_s19, 4  ;;  %s1033_s10 = int_to_ptr.vmem [resolvable:$false] %s1032_s10 }
 0x18f   : > { %p1030_p6 = pnand %p1029_p2, %p1623_p3  ;;  %s1034_s8 = scalar_lea.vmem %s1033_s10, 4096 }
 0x190   : > { %p1035_p12 = scmp.lt.s32.totalorder %s1518_s24, %s1033_s10  ;;  %p1036_p0 = scmp.lt.s32.totalorder %s1034_s8, %s1028_s25 }
 0x191   : > { %p1031_p10 = pneg %p1030_p6 }
 0x192   : > { %p1037_p8 = por %p1036_p0, %p1035_p12 }
 0x194   : > { %p1038_p11 = pnand %p1037_p8, %p1031_p10 }
 0x196   : > { %1041 = shalt.err (!%p1038_p11)
}
 0x197   : > { %s1042_s15 = scalar_lea.hbm %s1515_s28, 2048  ;;  %s1046_s20 = scalar_lea.hbm %s1586_s3, 4096 }
 0x198   : > { %p1043_p13 = scmp.ne.s32.totalorder %s1515_s28, %s1042_s15  ;;  %p1047_p1 = scmp.lt.u32.totalorder %s1515_s28, %s1586_s3 }
 0x199   : > { %p1048_p5 = scmp.lt.u32.totalorder %s1046_s20, %s1042_s15  ;;  %p1050_p2 = scmp.lt.u32.totalorder %s1042_s15, %s1515_s28 }
 0x19a   : > { %p1044_p7 = pnand %p1043_p13, %p1623_p3 }
 0x19b   : > { %p1049_p4 = por %p1048_p5, %p1047_p1 }
 0x19c   : > { %p1045_p9 = pneg %p1044_p7 }
 0x19d   : > { %p1051_p6 = por %p1050_p2, %p1049_p4 }
 0x19f   : > { %p1052_p10 = pnand %p1051_p6, %p1045_p9 }
 0x1a1   : > { %1055 = shalt.err (!%p1052_p10)
}
 0x1a2   : > { %s1163_s29 = smov 128   ;;  %s1164_s9 = smov 8  }
 0x1a3   : > { %857 = dma.vmem_to_hbm [thread:$0]  (%p1623_p3), %s1518_s24, 2048, %s1515_s28, %s1522_s1, %s1163_s29, %s1163_s29, %s1164_s9  }
 0x1a4 PF: > { %s1624_s11 = sld [smem:[#allocation11_spill]]  ;;  %s1625_s18 = sld [smem:[#allocation13_spill]] }
 0x1a5   : > { %p874_p12 = scmp.ge.s32.totalorder %s1154_s22, 2 }
 0x1aa   : > { %s588_s6 = sand.u32 1, %s1624_s11   ;;  %p1626_p0 = scmp.ne.s32.totalorder %s1625_s18, 0 }
 0x1ab   : > { %s589_s27 = scalar_lea.sflag [#allocation4], %s588_s6 }
 0x1ac   : > { %p868_p8 = pnand %p874_p12, %p1626_p0 }
 0x1ae   : > { %1109 = dma.done.wait (!%p868_p8), %s589_s27, 2048  }
 0x1af   : > { %1111 = vsyncadd (!%p868_p8), %s589_s27, 4294965248  ;;  %s20_s22 = sadd.s32 1, %s1154_s22   ;;  %s1627_s18 = sld [smem:[#allocation12_spill]] }
 0x1b0   : > { %p17_p11 = scmp.ge.s32.totalorder %s20_s22, 6   ;;  %s1628_s20 = sld [smem:[#allocation14_spill]] }
 0x1b1   : > { %s1629_s30 = sld [smem:[#allocation15_spill]]  ;;  %s1630_s12 = smov %s1118_s13 }
 0x1b2   : > { %s1631_s13 = smov %s1122_s14  ;;  %s1632_s14 = smov %s1336_s7 }
 0x1b3   : > { %s1633_s15 = smov %s1130_s16  ;;  %s1634_s16 = smov %s1134_s17 }
 0x1b4   : > { %s1635_s17 = smov %s1341_s4  ;;  %s1636_s19 = smov %s1150_s21 }
 0x1b5   :  { %19 = sbr.rel (!%p17_p11) target bundleno = 12 (0xc), region = 94 }
 0x1b7   : > { %s1637_s21 = smov %s1629_s30 }
 0x1bc   :  { %594 = vsyncpa [#allocation3], 1 }
 0x1bd   :  { %596 = vsyncpa [#allocation3 + $0x1], 1 }
 0x1be   :  { %597 = vsyncpa [#allocation6], 1 }
 0x1bf   :  { %598 = vsyncpa [#allocation4], 1 }
 0x1c0   :  { %600 = vsyncpa [#allocation4 + $0x1], 1 }

</bundles_post_ra>
